<compile_context>
chip_gen: v7x
topology: tpu7x:2x2x1
jax: 0.10.0
libtpu: 0.0.40
codegen_flags: <defaults>
</compile_context>

<pallas_src>
import functools
import math

import jax
import jax.numpy as jnp
from jax.experimental import pallas as pl
from jax.experimental.pallas import tpu as pltpu


def _round_up(x, m):
    return (x + m - 1) // m * m


# ----------------------------------------------------------------------------
# Kernel 1: EqualizedFC (style MLP)  y = leaky_relu(x @ W.T * w_coef + b*b_coef)
# ----------------------------------------------------------------------------
def _style_fc_kernel(x_ref, w_ref, b_ref, o_ref, *, w_coef, negative_slope):
    # x_ref: (tm, K)   w_ref: (tn, K)   b_ref: (1, tn)  (bias already * b_coef)
    # Contract over K directly -- no explicit transpose of the weight tile.
    y = jax.lax.dot_general(
        x_ref[...], w_ref[...],
        dimension_numbers=(((1,), (1,)), ((), ())),
        preferred_element_type=jnp.float32)
    # Fold the weight scale onto the small output tile instead of the full weight.
    y = y * jnp.float32(w_coef) + b_ref[...]
    o_ref[...] = jnp.where(y >= 0, y, negative_slope * y).astype(o_ref.dtype)


def equalized_fc(x, weight, bias, w_coef, b_coef, *, negative_slope=0.2):
    """x: (B, in_c) f32, weight: (out_c, in_c) f32 -> (B, out_c) f32."""
    B, K = x.shape
    N = weight.shape[0]

    # Large, lane/sublane-aligned tiles; pad and slice outside the kernel.
    tile_m = min(256, _round_up(B, 8))
    Mp = _round_up(B, tile_m)
    tile_n = min(512, _round_up(N, 128))
    Np = _round_up(N, tile_n)

    xp = x if Mp == B else jnp.pad(x, ((0, Mp - B), (0, 0)))
    wp = weight if Np == N else jnp.pad(weight, ((0, Np - N), (0, 0)))
    if bias is None:
        bp = jnp.zeros((1, Np), jnp.float32)
    else:
        bp = jnp.pad(bias * jnp.float32(b_coef), (0, Np - N)).reshape(1, Np)

    kernel = functools.partial(_style_fc_kernel, w_coef=float(w_coef),
                               negative_slope=negative_slope)
    # NOTE: for very large in_c a K grid axis (+ f32 accumulator scratch) and a
    # bf16 weight cast would bound VMEM further; not needed at these sizes.
    out = pl.pallas_call(
        kernel,
        out_shape=jax.ShapeDtypeStruct((Mp, Np), jnp.float32),
        grid_spec=pltpu.PrefetchScalarGridSpec(
            num_scalar_prefetch=0,
            grid=(Mp // tile_m, Np // tile_n),
            in_specs=[
                pl.BlockSpec((tile_m, K), lambda i, j: (i, 0)),   # x tile
                pl.BlockSpec((tile_n, K), lambda i, j: (j, 0)),   # weight N-tile
                pl.BlockSpec((1, tile_n), lambda i, j: (0, j)),   # scaled bias
            ],
            out_specs=pl.BlockSpec((tile_m, tile_n), lambda i, j: (i, j)),
        ),
        compiler_params=pltpu.CompilerParams(
            dimension_semantics=("parallel", "parallel"),
        ),
    )(xp, wp, bp)
    return out[:B, :N]


# ----------------------------------------------------------------------------
# Kernel 2: fused spatial epilogue (noise + leaky_relu + instance-norm + style)
# ----------------------------------------------------------------------------
def _layer_epilogue_kernel(x_ref, noise_ref, nw_ref, ss_ref, sb_ref, o_ref, *,
                           eps, negative_slope, use_noise, use_norm, use_style):
    # x_ref: (1, C, HW)  noise_ref: (1, 1, HW)  nw/ss/sb: (1, C, 1)
    x = x_ref[...]
    if use_noise:
        x = x + nw_ref[...] * noise_ref[...]
    x = jnp.where(x >= 0, x, negative_slope * x)
    if use_norm:  # the PyTorch module applies InstanceNorm under use_pixel_norm
        m = jnp.mean(x, axis=2, keepdims=True)
        xc = x - m
        v = jnp.mean(xc * xc, axis=2, keepdims=True)
        x = xc * jax.lax.rsqrt(v + jnp.float32(eps))
    if use_style:
        x = x * ss_ref[...] + sb_ref[...]
    o_ref[...] = x.astype(o_ref.dtype)


def layer_epilogue(x, noise, dlatent, params, *, use_noise=True,
                   use_pixel_norm=True, use_instance_norm=True, use_style=True,
                   eps=1e-8):
    """x: (B,C,H,W), noise: (B,1,H,W), dlatent: (B, dlatent_size) -> (B,C,H,W)."""
    del use_instance_norm  # flag is unused in the PyTorch forward as well
    B, C, H, W = x.shape
    HW = H * W
    x3 = x.reshape(B, C, HW).astype(jnp.float32)

    if use_style:
        style = equalized_fc(dlatent, params["style_w"], params["style_b"],
                             params["w_coef"], params["b_coef"])  # (B, 2C)
        style = style.reshape(B, 2, C)
        ss = (style[:, 0] + 1.0).reshape(B, C, 1)
        sb = style[:, 1].reshape(B, C, 1)
    else:
        ss = jnp.ones((B, C, 1), jnp.float32)
        sb = jnp.zeros((B, C, 1), jnp.float32)

    if use_noise:
        noise3 = noise.reshape(B, 1, HW).astype(jnp.float32)
        nw = params["noise_weight"].reshape(1, C, 1).astype(jnp.float32)
    else:
        noise3 = jnp.zeros((B, 1, HW), jnp.float32)
        nw = jnp.zeros((1, C, 1), jnp.float32)

    kernel = functools.partial(
        _layer_epilogue_kernel, eps=float(eps), negative_slope=0.2,
        use_noise=use_noise, use_norm=use_pixel_norm, use_style=use_style)

    out = pl.pallas_call(
        kernel,
        out_shape=jax.ShapeDtypeStruct((B, C, HW), jnp.float32),
        grid_spec=pltpu.PrefetchScalarGridSpec(
            num_scalar_prefetch=0,
            grid=(B,),
            in_specs=[
                pl.BlockSpec((1, C, HW), lambda b: (b, 0, 0)),  # x
                pl.BlockSpec((1, 1, HW), lambda b: (b, 0, 0)),  # noise
                pl.BlockSpec((1, C, 1), lambda b: (0, 0, 0)),   # noise weight
                pl.BlockSpec((1, C, 1), lambda b: (b, 0, 0)),   # style scale+1
                pl.BlockSpec((1, C, 1), lambda b: (b, 0, 0)),   # style shift
            ],
            out_specs=pl.BlockSpec((1, C, HW), lambda b: (b, 0, 0)),
        ),
        compiler_params=pltpu.CompilerParams(
            dimension_semantics=("parallel",),
        ),
    )(x3, noise3, nw, ss, sb)
    return out.reshape(B, C, H, W)


# ----------------------------------------------------------------------------
# Parameter construction (mirrors the PyTorch __init__)
# ----------------------------------------------------------------------------
def make_equalized_fc_params(key, in_c, out_c, gain=2 ** 0.5, use_wscale=False,
                             lrmul=1.0, bias=True):
    fan_in = in_c * out_c
    he_std = gain / math.sqrt(fan_in)
    if use_wscale:
        init_std = 1.0 / lrmul
        w_coef = he_std * lrmul
    else:
        init_std = he_std / lrmul
        w_coef = lrmul
    weight = jax.random.normal(key, (out_c, in_c), dtype=jnp.float32) * init_std
    b = jnp.zeros((out_c,), dtype=jnp.float32) if bias else None
    b_coef = lrmul if bias else 0.0
    return weight, b, float(w_coef), float(b_coef)


def make_layer_epilogue_params(key, channels, dlatent_size, use_wscale=False,
                               lrmul=1.0):
    k_nw, k_sw = jax.random.split(key)
    # ApplyNoise init is zeros in the module; use small random values here so
    # the noise path is numerically exercised by the check.
    noise_weight = 0.1 * jax.random.normal(k_nw, (channels,), jnp.float32)
    w, b, w_coef, b_coef = make_equalized_fc_params(
        k_sw, dlatent_size, channels * 2, gain=1.0, use_wscale=use_wscale,
        lrmul=lrmul, bias=True)
    return dict(noise_weight=noise_weight, style_w=w, style_b=b,
                w_coef=w_coef, b_coef=b_coef)


# ----------------------------------------------------------------------------
# Pure-JAX reference (mirrors LayerEpilogue.forward)
# ----------------------------------------------------------------------------
def _reference(x, noise, dlatent, params, *, use_noise, use_pixel_norm,
               use_style, eps=1e-8):
    if use_noise:
        x = x + params["noise_weight"].reshape(1, -1, 1, 1) * noise
    x = jnp.where(x >= 0, x, 0.2 * x)
    if use_pixel_norm:
        m = jnp.mean(x, axis=(2, 3), keepdims=True)
        xc = x - m
        v = jnp.mean(xc * xc, axis=(2, 3), keepdims=True)
        x = xc * jax.lax.rsqrt(v + eps)
    if use_style:
        y = dlatent @ (params["style_w"] * params["w_coef"]).T \
            + params["style_b"] * params["b_coef"]
        y = jnp.where(y >= 0, y, 0.2 * y)
        style = y.reshape(x.shape[0], 2, x.shape[1], 1, 1)
        x = x * (style[:, 0] + 1.0) + style[:, 1]
    return x


if __name__ == "__main__":
    key = jax.random.PRNGKey(0)
    k_params, k_x, k_lat, k_noise = jax.random.split(key, 4)

    B, C, H, W = 2, 4, 16, 16
    dlatent_size = 32

    params = make_layer_epilogue_params(k_params, C, dlatent_size,
                                        use_wscale=True)
    x = jax.random.normal(k_x, (B, C, H, W), dtype=jnp.float32)
    dlatent = jax.random.normal(k_lat, (B, dlatent_size), dtype=jnp.float32)
    # The PyTorch ApplyNoise draws fresh randn(B,1,H,W) inside forward; drawn
    # here deterministically and passed in so kernel and reference agree.
    noise = jax.random.normal(k_noise, (B, 1, H, W), dtype=jnp.float32)

    out = layer_epilogue(x, noise, dlatent, params,
                         use_noise=True, use_pixel_norm=True,
                         use_instance_norm=True, use_style=True)
    out = jax.block_until_ready(out)

    ref = _reference(x, noise, dlatent, params, use_noise=True,
                     use_pixel_norm=True, use_style=True)
    assert out.shape == (B, C, H, W)
    assert jnp.allclose(out, ref, atol=1e-4, rtol=1e-4), "mismatch vs reference"

    print("KERNEL_OK")
</pallas_src>

<mosaic_0001>
module attributes {stable_mosaic.version = 11 : i64} {
  func.func @_style_fc_kernel(%arg0: i32, %arg1: i32, %arg2: memref<8x32xf32, #tpu.memory_space<vmem>>, %arg3: memref<128x32xf32, #tpu.memory_space<vmem>>, %arg4: memref<1x128xf32, #tpu.memory_space<vmem>>, %arg5: memref<8x128xf32, #tpu.memory_space<vmem>>) attributes {dimension_semantics = [#tpu.dimension_semantics<parallel>, #tpu.dimension_semantics<parallel>], iteration_bounds = array<i64: 1, 1>, scalar_prefetch = 0 : i64, scratch_operands = 0 : i64, tpu.core_type = #tpu.core_type<tc>, window_params = [{transform_indices = @transform_0, window_bounds = array<i64: 8, 32>}, {transform_indices = @transform_1, window_bounds = array<i64: 128, 32>}, {transform_indices = @transform_2, window_bounds = array<i64: 1, 128>}, {transform_indices = @transform_3, window_bounds = array<i64: 8, 128>}]} {
    %c0 = arith.constant 0 : index
    %c0_0 = arith.constant 0 : index
    %0 = vector.load %arg2[%c0, %c0_0] : memref<8x32xf32, #tpu.memory_space<vmem>>, vector<8x32xf32>
    %c0_1 = arith.constant 0 : index
    %c0_2 = arith.constant 0 : index
    %1 = vector.load %arg3[%c0_1, %c0_2] : memref<128x32xf32, #tpu.memory_space<vmem>>, vector<128x32xf32>
    %cst = arith.constant dense<0.000000e+00> : vector<8x128xf32>
    %2 = tpu.matmul %0, %1, %cst {dimension_numbers = #tpu.dot_dimension_numbers<[1], [1], [0], [0], [0, 0, 1, 0], [], []>} : vector<8x32xf32>, vector<128x32xf32>, vector<8x128xf32> -> vector<8x128xf32>
    %cst_3 = arith.constant 6.250000e-02 : f32
    %3 = vector.broadcast %cst_3 : f32 to vector<8x128xf32>
    %4 = arith.mulf %2, %3 : vector<8x128xf32>
    %c0_4 = arith.constant 0 : index
    %c0_5 = arith.constant 0 : index
    %5 = vector.load %arg4[%c0_4, %c0_5] : memref<1x128xf32, #tpu.memory_space<vmem>>, vector<1x128xf32>
    %6 = vector.broadcast %5 : vector<1x128xf32> to vector<8x128xf32>
    %7 = arith.addf %4, %6 : vector<8x128xf32>
    %cst_6 = arith.constant 0.000000e+00 : f32
    %8 = vector.broadcast %cst_6 : f32 to vector<8x128xf32>
    %9 = arith.cmpf oge, %7, %8 : vector<8x128xf32>
    %cst_7 = arith.constant 2.000000e-01 : f32
    %10 = vector.broadcast %cst_7 : f32 to vector<8x128xf32>
    %11 = arith.mulf %10, %7 : vector<8x128xf32>
    %12 = arith.select %9, %7, %11 : vector<8x128xi1>, vector<8x128xf32>
    %c0_8 = arith.constant 0 : index
    %c0_9 = arith.constant 0 : index
    %13 = vector.load %arg5[%c0_8, %c0_9] : memref<8x128xf32, #tpu.memory_space<vmem>>, vector<8x128xf32>
    tpu.vector_store %arg5[%c0_8, %c0_9], %12 {strides = array<i32>} : memref<8x128xf32, #tpu.memory_space<vmem>>, vector<8x128xf32>,
    return
  }
  func.func @transform_0(%arg0: i32, %arg1: i32) -> (i32, i32) {
    %c0_i32 = arith.constant 0 : i32
    %c0_i32_0 = arith.constant 0 : i32
    return %arg0, %c0_i32 : i32, i32
  }
  func.func @transform_1(%arg0: i32, %arg1: i32) -> (i32, i32) {
    %c0_i32 = arith.constant 0 : i32
    %c0_i32_0 = arith.constant 0 : i32
    return %arg1, %c0_i32 : i32, i32
  }
  func.func @transform_2(%arg0: i32, %arg1: i32) -> (i32, i32) {
    %c0_i32 = arith.constant 0 : i32
    %c0_i32_0 = arith.constant 0 : i32
    return %c0_i32, %arg1 : i32, i32
  }
  func.func @transform_3(%arg0: i32, %arg1: i32) -> (i32, i32) {
    %c0_i32 = arith.constant 0 : i32
    return %arg0, %arg1 : i32, i32
  }
}

</mosaic_0001>

<bundles_post_ra>
// kernel: tpu_custom_call.1
= control target key start
LH: loop header
LB: loop body
LE: loop exit
PB: predicated region body
PF: predicated region fallthrough
CT: control target
= control target key end

     0   :  { %vm32_vm0 = vcmask 261120   ;;  %v311_v2 = vmov 0.0|0.0   ;;  %vm312_vm2 = vmmov 0   ;;  %v313_v5 = vmov 0.0   ;;  %s424_s0 = inlined_call_operand.vmem [shape: f32[8,32], index: 0, kind: input, shape index: {}]   ;;  %s425_s1 = inlined_call_operand.vmem [shape: f32[128,32], index: 1, kind: input, shape index: {}]   ;;  %s426_s2 = inlined_call_operand.vmem [shape: f32[1,128], index: 2, kind: input, shape index: {}]   ;;  %s427_s3 = inlined_call_operand.hbm [shape: f32[8,128], index: 3, kind: output, shape index: {}]  }
   0x1   :  { %v16_v0 = vld [vmem:[%s425_s1] sm:$0xff]  ;;  %v17_v1 = vld [vmem:[%s425_s1 + $0x8] sm:$0xff]  ;;  %251 = vmatprep.subr.bf16.mxu0 %v311_v2  ;;  %vm343_vm1 = vmpackc.low %vm32_vm0, %vm32_vm0  ;;  %248 = vmatprep.mubr.msk.f32.mxu0 %vm312_vm2, %v313_v5 }
   0x2   :  { %v252_v3 = vpack.c.bf16 %v17_v1, %v16_v0  ;;  %v18_v6 = vld [vmem:[%s425_s1 + $0x10] sm:$0xff]  ;;  %v19_v7 = vld [vmem:[%s425_s1 + $0x18] sm:$0xff] }
   0x4   :  { %254 = vmatpush3.bf16.xpose.msk.msra.mxu0 %vm343_vm1, %v252_v3 }
   0x5   :  { %255 = vmatprep.subr.bf16.mxu0 %v311_v2 }
   0x6   :  { %8 = vsyncpa [#allocation3], 0  ;;  %v256_v8 = vpack.c.bf16 %v19_v7, %v18_v6  ;;  %v20_v9 = vld [vmem:[%s425_s1 + $0x20] sm:$0xff]  ;;  %v21_v10 = vld [vmem:[%s425_s1 + $0x28] sm:$0xff]  ;;  %s314_s21 = smov [#allocation2]  }
   0x7   :  { %v260_v11 = vpack.c.bf16 %v21_v10, %v20_v9  ;;  %v22_v12 = vld [vmem:[%s425_s1 + $0x30] sm:$0xff]  ;;  %v23_v13 = vld [vmem:[%s425_s1 + $0x38] sm:$0xff]  ;;  %v24_v15 = vld [vmem:[%s425_s1 + $0x40] sm:$0xff] }
   0x8   :  { %v264_v14 = vpack.c.bf16 %v23_v13, %v22_v12  ;;  %v25_v16 = vld [vmem:[%s425_s1 + $0x48] sm:$0xff]  ;;  %v26_v18 = vld [vmem:[%s425_s1 + $0x50] sm:$0xff]  ;;  %v27_v19 = vld [vmem:[%s425_s1 + $0x58] sm:$0xff] }
   0x9   :  { %v268_v17 = vpack.c.bf16 %v25_v16, %v24_v15  ;;  %v272_v20 = vpack.c.bf16 %v27_v19, %v26_v18  ;;  %v28_v21 = vld [vmem:[%s425_s1 + $0x60] sm:$0xff]  ;;  %v29_v22 = vld [vmem:[%s425_s1 + $0x68] sm:$0xff]  ;;  %v30_v24 = vld [vmem:[%s425_s1 + $0x70] sm:$0xff] }
   0xa   :  { %v276_v23 = vpack.c.bf16 %v29_v22, %v28_v21  ;;  %v31_v25 = vld [vmem:[%s425_s1 + $0x78] sm:$0xff]  ;;  %v15_v27 = vld [vmem:[%s424_s0] sm:$0xff]  ;;  %s173_s1 = sshll.u32 %s314_s21, 4  ;;  %s174_s1 = int_to_ptr.vmem [resolvable:$true] %s173_s1 }
   0xb   :  { %v280_v26 = vpack.c.bf16 %v31_v25, %v30_v24  ;;  %v198_v29 = vld [vmem:[%s426_s2] ss:$0 sm:$0xff]  ;;  %s287_s22 = scalar_lea.vmem %s174_s1, 128  ;;  %p292_p1 = scmp.lt.s32.totalorder %s174_s1, %s174_s1 }
   0xc   :  { %258 = vmatpush3.bf16.xpose.msk.msra.mxu0 %vm343_vm1, %v256_v8  ;;  %p288_p0 = scmp.ne.s32.totalorder %s174_s1, %s287_s22  ;;  %p293_p2 = scmp.lt.s32.totalorder %s287_s22, %s287_s22 }
   0xd   :  { %259 = vmatprep.subr.bf16.mxu0 %v311_v2 }
   0xe   :  { %p294_p3 = por %p293_p2, %p292_p1 }
  0x10   :  { %p295_p4 = pnand %p294_p3, %p288_p0 }
  0x14   :  { %262 = vmatpush3.bf16.xpose.msk.msra.mxu0 %vm343_vm1, %v260_v11 }
  0x15   :  { %263 = vmatprep.subr.bf16.mxu0 %v311_v2 }
  0x1c   :  { %266 = vmatpush3.bf16.xpose.msk.msra.mxu0 %vm343_vm1, %v264_v14 }
  0x1d   :  { %267 = vmatprep.subr.bf16.mxu0 %v311_v2 }
  0x24   :  { %270 = vmatpush3.bf16.xpose.msk.msra.mxu0 %vm343_vm1, %v268_v17 }
  0x25   :  { %271 = vmatprep.subr.bf16.mxu0 %v311_v2 }
  0x2c   :  { %274 = vmatpush3.bf16.xpose.msk.msra.mxu0 %vm343_vm1, %v272_v20 }
  0x2d   :  { %275 = vmatprep.subr.bf16.mxu0 %v311_v2 }
  0x34   :  { %278 = vmatpush3.bf16.xpose.msk.msra.mxu0 %vm343_vm1, %v276_v23 }
  0x35   :  { %279 = vmatprep.subr.bf16.mxu0 %v311_v2 }
  0x3c   :  { %282 = vmatpush3.bf16.xpose.msk.msra.mxu0 %vm343_vm1, %v280_v26 }
  0x43   :  { %249 = vmatmul.mubr.msk.f32.vlgmr.msra.gmra.mrb[0].mxu0 %vm32_vm0, %v15_v27 }
 0x116   :  { %v150_v28 = vpop.f32.mrb[0].mxu0 }
 0x117   :  { %v154_v30 = vmul.f32 0.0625, %v150_v28  ;;  %v250_v31 = vpop.f32.mrb[1].mxu0 }
 0x119   :  { %v162_v32 = vadd.f32 %v198_v29, %v154_v30 }
 0x11b   :  { %vm163_vm3 = vcmp.ge.f32.partialorder %v162_v32, 0.0  ;;  %v164_v33 = vmul.f32 0.2, %v162_v32 }
 0x11d   :  { %v165_v34 = vsel %vm163_vm3, %v162_v32, %v164_v33 }
 0x11e   :  { %166 = vst [vmem:[#allocation2] sm:$0xff] %v165_v34 }
 0x11f   :  { %298 = shalt.err (!%p295_p4)
}
 0x120   :  { %s299_s2 = scalar_lea.hbm %s427_s3, 128 }
 0x121   :  { %p300_p5 = scmp.ne.s32.totalorder %s427_s3, %s299_s2  ;;  %p303_p6 = scmp.lt.u32.totalorder %s299_s2, %s427_s3 }
 0x123   :  { %p305_p7 = pnand %p303_p6, %p300_p5 }
 0x125   :  { %308 = shalt.err (!%p305_p7)
}
 0x126   :  { %176 = dma.vmem_to_hbm [thread:$0]  %s174_s1, 128, %s427_s3, [#allocation3]  }
 0x127   :  { %309 = dma.done.wait [#allocation3], 128  }
 0x128   :  { %310 = vsyncadd [#allocation3], 4294967168 }
 0x129   :  { %180 = vsyncpa [#allocation3], 1 }

</bundles_post_ra>
